<compile_context>
chip_gen: v6e
topology: v6e:2x2x1
jax: 0.10.0
libtpu: 0.0.40
codegen_flags: <defaults>
</compile_context>

<pallas_src>
import functools

import jax
import jax.numpy as jnp
from jax.experimental import pallas as pl
from jax.experimental.pallas import tpu as pltpu


def _round_up(x, m):
    return (x + m - 1) // m * m


# ---------------------------------------------------------------------------
# Kernel
# ---------------------------------------------------------------------------
def _toy_actor_critic_kernel(apply_softmax, n_actions,
                             state_ref, ws_ref, bs_ref, wh_ref, bh_ref,
                             out_ref):
    x = state_ref[...]                                      # (TB, S)

    # Shared layer on the MXU: (TB, S) @ (S, H_pad) + bias, then ReLU.
    # K = state_size is tiny, but this keeps the (tb, H_pad) work off the VPU
    # (no f32 FMA on v5e/v6e) and in the MXU/vex slot, which has slack.
    hidden = jnp.dot(x, ws_ref[...],
                     preferred_element_type=jnp.float32) + bs_ref[...]
    hidden = jnp.maximum(hidden, 0.0)                       # (TB, H_pad)

    # Fused actor+critic head: (TB, H_pad) @ (H_pad, OUT_LANES).
    logits = jnp.dot(hidden, wh_ref[...],
                     preferred_element_type=jnp.float32) + bh_ref[...]

    if apply_softmax:
        lane = jax.lax.broadcasted_iota(jnp.int32, logits.shape, 1)
        is_action = lane < n_actions
        masked = jnp.where(is_action, logits, -jnp.inf)
        m = jnp.max(masked, axis=-1, keepdims=True)
        e = jnp.exp(masked - m)                             # padded lanes -> 0
        denom = jnp.sum(e, axis=-1, keepdims=True)
        # EUP approximate reciprocal + one Newton step: keeps the divide off
        # the VPU while restoring ~f32 accuracy (row sums == 1 to ~1e-6).
        inv = pl.reciprocal(denom, approx=True)
        inv = inv * (2.0 - denom * inv)
        probs = e * inv
        # lanes [0, A): probs ; lane A: raw critic value ; rest: padded logits.
        out_ref[...] = jnp.where(is_action, probs, logits)
    else:
        out_ref[...] = logits


# ---------------------------------------------------------------------------
# One-time parameter packing (hoisted out of the per-call hot path)
# ---------------------------------------------------------------------------
def pack_params(params, *, out_lanes=128):
    """Zero-pad / fuse the weights once.  Returned dict feeds every forward.

    out_lanes=128 gives unmasked lane-dense stores (default);
    out_lanes=8 (>= n_actions+1) cuts v5e HBM writeback 16x at the cost of
    masked partial stores — benchmark per generation.
    """
    S, H = params["w_shared"].shape
    A = params["w_actor"].shape[1]
    assert A + 1 <= out_lanes, "n_actions + 1 must fit in out_lanes"
    h_pad = _round_up(H, 128)                               # 200 -> 256

    ws = jnp.zeros((S, h_pad), jnp.float32).at[:, :H].set(
        params["w_shared"].astype(jnp.float32))
    bs = jnp.zeros((1, h_pad), jnp.float32).at[:, :H].set(
        params["b_shared"].reshape(1, H).astype(jnp.float32))

    wh = jnp.zeros((h_pad, out_lanes), jnp.float32)
    wh = wh.at[:H, :A].set(params["w_actor"].astype(jnp.float32))
    wh = wh.at[:H, A:A + 1].set(params["w_critic"].astype(jnp.float32))
    bh = jnp.zeros((1, out_lanes), jnp.float32)
    bh = bh.at[:, :A].set(params["b_actor"].reshape(1, A).astype(jnp.float32))
    bh = bh.at[:, A:A + 1].set(params["b_critic"].reshape(1, 1).astype(jnp.float32))

    return {"ws": ws, "bs": bs, "wh": wh, "bh": bh, "n_actions": int(A)}


# ---------------------------------------------------------------------------
# Forward (jitted hot path)
# ---------------------------------------------------------------------------
@functools.partial(jax.jit, static_argnames=("n_actions", "keep_action_logits",
                                             "block_batch"))
def _forward_packed(state, ws, bs, wh, bh, *, n_actions,
                    keep_action_logits, block_batch):
    B, S = state.shape
    h_pad = ws.shape[1]
    out_lanes = wh.shape[1]

    # Batch tiling: big tiles amortize the ~0.35 us per-grid-step overhead;
    # for batches that fit in one block, split in two so the "parallel" grid
    # has >= 2 steps and both v7x TensorCores get work.
    b8 = _round_up(B, 8)
    if b8 <= 8:
        tb = b8
    else:
        tb = min(block_batch, _round_up((b8 + 1) // 2, 8))
    b_pad = _round_up(b8, tb)

    state_p = state.astype(jnp.float32)
    if b_pad != B:
        state_p = jnp.pad(state_p, ((0, b_pad - B), (0, 0)))

    kernel = functools.partial(_toy_actor_critic_kernel,
                               not keep_action_logits, n_actions)

    # Rough VMEM footprint (double-buffered state/out tiles, weights, temps).
    vmem_est = 4 * (2 * tb * (S + out_lanes)
                    + 2 * (S * h_pad + h_pad + h_pad * out_lanes + out_lanes)
                    + tb * (h_pad + 2 * out_lanes))
    cp_kwargs = dict(dimension_semantics=("parallel",))
    if vmem_est > 12 * 1024 * 1024:          # only needed for very large tiles
        cp_kwargs["vmem_limit_bytes"] = min(int(vmem_est * 2), 100 * 1024 * 1024)

    out = pl.pallas_call(
        kernel,
        out_shape=jax.ShapeDtypeStruct((b_pad, out_lanes), jnp.float32),
        grid=(b_pad // tb,),
        in_specs=[
            pl.BlockSpec((tb, S), lambda i: (i, 0)),              # state tile
            pl.BlockSpec((S, h_pad), lambda i: (0, 0)),           # w_shared
            pl.BlockSpec((1, h_pad), lambda i: (0, 0)),           # b_shared
            pl.BlockSpec((h_pad, out_lanes), lambda i: (0, 0)),   # fused head W
            pl.BlockSpec((1, out_lanes), lambda i: (0, 0)),       # fused head b
        ],
        out_specs=pl.BlockSpec((tb, out_lanes), lambda i: (i, 0)),
        compiler_params=pltpu.CompilerParams(**cp_kwargs),
    )(state_p, ws, bs, wh, bh)

    probs = out[:B, :n_actions]
    values = out[:B, n_actions:n_actions + 1]
    return probs, values


def toy_actor_critic_forward(state, packed, *, critic=False,
                             keep_action_logits=False, block_batch=512):
    """Pallas implementation of TOYActorCritic.forward.

    state  : (B, state_size) float32
    packed : output of pack_params(params)
    Returns (action_probs_or_logits, state_values); state_values is None when
    critic=False, matching the PyTorch module.
    """
    probs, values = _forward_packed(
        state, packed["ws"], packed["bs"], packed["wh"], packed["bh"],
        n_actions=packed["n_actions"],
        keep_action_logits=keep_action_logits,
        block_batch=block_batch)
    return probs, (values if critic else None)


# ---------------------------------------------------------------------------
# Synthetic init + pure-JAX reference
# ---------------------------------------------------------------------------
def init_params(key, state_size=4, n_actions=5, hidden_size=200):
    """Deterministic synthetic init mimicking nn.Linear's U(-1/sqrt(fan_in), .)."""
    ks = jax.random.split(key, 6)

    def lin(kw, kb, fan_in, fan_out):
        bound = 1.0 / jnp.sqrt(fan_in)
        w = jax.random.uniform(kw, (fan_in, fan_out), jnp.float32, -bound, bound)
        b = jax.random.uniform(kb, (1, fan_out), jnp.float32, -bound, bound)
        return w, b

    w_s, b_s = lin(ks[0], ks[1], state_size, hidden_size)
    w_a, b_a = lin(ks[2], ks[3], hidden_size, n_actions)
    w_c, b_c = lin(ks[4], ks[5], hidden_size, 1)
    return {"w_shared": w_s, "b_shared": b_s,
            "w_actor": w_a, "b_actor": b_a,
            "w_critic": w_c, "b_critic": b_c}


def reference_forward(state, params, *, critic=False, keep_action_logits=False):
    """Pure-JAX reference for correctness checking."""
    h = jnp.maximum(state @ params["w_shared"] + params["b_shared"], 0.0)
    logits = h @ params["w_actor"] + params["b_actor"]
    probs = logits if keep_action_logits else jax.nn.softmax(logits, axis=-1)
    values = (h @ params["w_critic"] + params["b_critic"]) if critic else None
    return probs, values


if __name__ == "__main__":
    key = jax.random.PRNGKey(0)
    k_param, k_state = jax.random.split(key)

    STATE_SIZE, N_ACTIONS, HIDDEN = 4, 5, 200
    BATCH = 8

    params = init_params(k_param, STATE_SIZE, N_ACTIONS, HIDDEN)
    packed = pack_params(params)                 # one-time weight packing
    state = jax.random.normal(k_state, (BATCH, STATE_SIZE), jnp.float32)

    # critic=True path (softmax + fused critic column)
    probs, values = toy_actor_critic_forward(state, packed, critic=True)
    probs = jax.block_until_ready(probs)
    values = jax.block_until_ready(values)

    ref_probs, ref_values = reference_forward(state, params, critic=True)
    assert probs.shape == (BATCH, N_ACTIONS)
    assert values.shape == (BATCH, 1)
    assert jnp.allclose(probs, ref_probs, atol=1e-5, rtol=1e-4)
    assert jnp.allclose(values, ref_values, atol=1e-5, rtol=1e-4)
    assert jnp.allclose(jnp.sum(probs, axis=-1), 1.0, atol=1e-5)

    # default path (critic=False -> values is None), keep_action_logits=True
    logits_only, none_values = toy_actor_critic_forward(
        state, packed, critic=False, keep_action_logits=True)
    logits_only = jax.block_until_ready(logits_only)
    assert none_values is None
    ref_logits, _ = reference_forward(state, params, critic=False,
                                      keep_action_logits=True)
    assert jnp.allclose(logits_only, ref_logits, atol=1e-5, rtol=1e-4)

    # odd batch (pad-to-tile / slice-back path)
    state3 = jax.random.normal(jax.random.PRNGKey(3), (3, STATE_SIZE), jnp.float32)
    p3, v3 = toy_actor_critic_forward(state3, packed, critic=True)
    p3 = jax.block_until_ready(p3)
    rp3, rv3 = reference_forward(state3, params, critic=True)
    assert p3.shape == (3, N_ACTIONS)
    assert jnp.allclose(p3, rp3, atol=1e-5, rtol=1e-4)
    assert jnp.allclose(v3, rv3, atol=1e-5, rtol=1e-4)

    # multi-tile batch (exercises the >=2-step grid / two-TC split path)
    state40 = jax.random.normal(jax.random.PRNGKey(7), (40, STATE_SIZE), jnp.float32)
    p40, v40 = toy_actor_critic_forward(state40, packed, critic=True)
    p40 = jax.block_until_ready(p40)
    rp40, rv40 = reference_forward(state40, params, critic=True)
    assert p40.shape == (40, N_ACTIONS)
    assert jnp.allclose(p40, rp40, atol=1e-5, rtol=1e-4)
    assert jnp.allclose(v40, rv40, atol=1e-5, rtol=1e-4)

    print("KERNEL_OK")
</pallas_src>

<mosaic_0001>
module attributes {stable_mosaic.version = 11 : i64} {
  func.func @_toy_actor_critic_kernel(%arg0: i32, %arg1: memref<8x4xf32, #tpu.memory_space<vmem>>, %arg2: memref<4x256xf32, #tpu.memory_space<vmem>>, %arg3: memref<1x256xf32, #tpu.memory_space<vmem>>, %arg4: memref<256x128xf32, #tpu.memory_space<vmem>>, %arg5: memref<1x128xf32, #tpu.memory_space<vmem>>, %arg6: memref<8x128xf32, #tpu.memory_space<vmem>>) attributes {dimension_semantics = [#tpu.dimension_semantics<parallel>], iteration_bounds = array<i64: 1>, scalar_prefetch = 0 : i64, scratch_operands = 0 : i64, tpu.core_type = #tpu.core_type<tc>, window_params = [{transform_indices = @transform_0, window_bounds = array<i64: 8, 4>}, {pipeline_mode = #tpu.pipeline_mode<synchronous>, transform_indices = @transform_1, window_bounds = array<i64: 4, 256>}, {pipeline_mode = #tpu.pipeline_mode<synchronous>, transform_indices = @transform_2, window_bounds = array<i64: 1, 256>}, {pipeline_mode = #tpu.pipeline_mode<synchronous>, transform_indices = @transform_3, window_bounds = array<i64: 256, 128>}, {pipeline_mode = #tpu.pipeline_mode<synchronous>, transform_indices = @transform_4, window_bounds = array<i64: 1, 128>}, {transform_indices = @transform_5, window_bounds = array<i64: 8, 128>}]} {
    %c0 = arith.constant 0 : index
    %c0_0 = arith.constant 0 : index
    %0 = vector.load %arg1[%c0, %c0_0] : memref<8x4xf32, #tpu.memory_space<vmem>>, vector<8x4xf32>
    %c0_1 = arith.constant 0 : index
    %c0_2 = arith.constant 0 : index
    %1 = vector.load %arg2[%c0_1, %c0_2] : memref<4x256xf32, #tpu.memory_space<vmem>>, vector<4x256xf32>
    %cst = arith.constant dense<0.000000e+00> : vector<8x256xf32>
    %2 = tpu.matmul %0, %1, %cst {dimension_numbers = #tpu.dot_dimension_numbers<[1], [0], [0], [1], [0, 0, 1, 1], [], []>} : vector<8x4xf32>, vector<4x256xf32>, vector<8x256xf32> -> vector<8x256xf32>
    %c0_3 = arith.constant 0 : index
    %c0_4 = arith.constant 0 : index
    %3 = vector.load %arg3[%c0_3, %c0_4] : memref<1x256xf32, #tpu.memory_space<vmem>>, vector<1x256xf32>
    %4 = vector.broadcast %3 : vector<1x256xf32> to vector<8x256xf32>
    %5 = arith.addf %2, %4 : vector<8x256xf32>
    %cst_5 = arith.constant 0.000000e+00 : f32
    %6 = vector.broadcast %cst_5 : f32 to vector<8x256xf32>
    %7 = arith.maximumf %5, %6 : vector<8x256xf32>
    %c0_6 = arith.constant 0 : index
    %c0_7 = arith.constant 0 : index
    %8 = vector.load %arg4[%c0_6, %c0_7] : memref<256x128xf32, #tpu.memory_space<vmem>>, vector<256x128xf32>
    %cst_8 = arith.constant dense<0.000000e+00> : vector<8x128xf32>
    %9 = tpu.matmul %7, %8, %cst_8 {dimension_numbers = #tpu.dot_dimension_numbers<[1], [0], [0], [1], [0, 0, 1, 1], [], []>} : vector<8x256xf32>, vector<256x128xf32>, vector<8x128xf32> -> vector<8x128xf32>
    %c0_9 = arith.constant 0 : index
    %c0_10 = arith.constant 0 : index
    %10 = vector.load %arg5[%c0_9, %c0_10] : memref<1x128xf32, #tpu.memory_space<vmem>>, vector<1x128xf32>
    %11 = vector.broadcast %10 : vector<1x128xf32> to vector<8x128xf32>
    %12 = arith.addf %9, %11 : vector<8x128xf32>
    %13 = tpu.iota {dimensions = array<i32: 1>} : vector<8x128xi32>
    %c5_i32 = arith.constant 5 : i32
    %14 = vector.broadcast %c5_i32 : i32 to vector<8x128xi32>
    %15 = arith.cmpi slt, %13, %14 : vector<8x128xi32>
    %cst_11 = arith.constant 0xFF800000 : f32
    %16 = vector.broadcast %cst_11 : f32 to vector<8x128xf32>
    %17 = arith.select %15, %12, %16 : vector<8x128xi1>, vector<8x128xf32>
    %cst_12 = arith.constant dense<0xFF800000> : vector<8xf32>
    %18 = vector.multi_reduction <maximumf>, %17, %cst_12 [1] : vector<8x128xf32> to vector<8xf32>
    %19 = vector.shape_cast %18 : vector<8xf32> to vector<8x1xf32>
    %20 = vector.broadcast %19 : vector<8x1xf32> to vector<8x128xf32>
    %21 = arith.subf %17, %20 : vector<8x128xf32>
    %22 = math.exp %21 : vector<8x128xf32>
    %cst_13 = arith.constant dense<0.000000e+00> : vector<8xf32>
    %23 = vector.multi_reduction <add>, %22, %cst_13 [1] : vector<8x128xf32> to vector<8xf32>
    %24 = vector.shape_cast %23 : vector<8xf32> to vector<8x1xf32>
    %25 = tpu.reciprocal %24 {approx = true} : vector<8x1xf32> -> vector<8x1xf32>
    %26 = arith.mulf %24, %25 : vector<8x1xf32>
    %cst_14 = arith.constant 2.000000e+00 : f32
    %27 = vector.broadcast %cst_14 : f32 to vector<8x1xf32>
    %28 = arith.subf %27, %26 : vector<8x1xf32>
    %29 = arith.mulf %25, %28 : vector<8x1xf32>
    %30 = vector.broadcast %29 : vector<8x1xf32> to vector<8x128xf32>
    %31 = arith.mulf %22, %30 : vector<8x128xf32>
    %32 = arith.select %15, %31, %12 : vector<8x128xi1>, vector<8x128xf32>
    %c0_15 = arith.constant 0 : index
    %c0_16 = arith.constant 0 : index
    %33 = vector.load %arg6[%c0_15, %c0_16] : memref<8x128xf32, #tpu.memory_space<vmem>>, vector<8x128xf32>
    tpu.vector_store %arg6[%c0_15, %c0_16], %32 {strides = array<i32>} : memref<8x128xf32, #tpu.memory_space<vmem>>, vector<8x128xf32>,
    return
  }
  func.func @transform_0(%arg0: i32) -> (i32, i32) {
    %c0_i32 = arith.constant 0 : i32
    %c0_i32_0 = arith.constant 0 : i32
    return %arg0, %c0_i32 : i32, i32
  }
  func.func @transform_1(%arg0: i32) -> (i32, i32) {
    %c0_i32 = arith.constant 0 : i32
    %c0_i32_0 = arith.constant 0 : i32
    %c0_i32_1 = arith.constant 0 : i32
    return %c0_i32, %c0_i32_0 : i32, i32
  }
  func.func @transform_2(%arg0: i32) -> (i32, i32) {
    %c0_i32 = arith.constant 0 : i32
    %c0_i32_0 = arith.constant 0 : i32
    %c0_i32_1 = arith.constant 0 : i32
    return %c0_i32, %c0_i32_0 : i32, i32
  }
  func.func @transform_3(%arg0: i32) -> (i32, i32) {
    %c0_i32 = arith.constant 0 : i32
    %c0_i32_0 = arith.constant 0 : i32
    %c0_i32_1 = arith.constant 0 : i32
    return %c0_i32, %c0_i32_0 : i32, i32
  }
  func.func @transform_4(%arg0: i32) -> (i32, i32) {
    %c0_i32 = arith.constant 0 : i32
    %c0_i32_0 = arith.constant 0 : i32
    %c0_i32_1 = arith.constant 0 : i32
    return %c0_i32, %c0_i32_0 : i32, i32
  }
  func.func @transform_5(%arg0: i32) -> (i32, i32) {
    %c0_i32 = arith.constant 0 : i32
    %c0_i32_0 = arith.constant 0 : i32
    return %arg0, %c0_i32 : i32, i32
  }
}

</mosaic_0001>

<bundles_post_ra>
// kernel: _forward_packed.1
= control target key start
LH: loop header
LB: loop body
LE: loop exit
PB: predicated region body
PF: predicated region fallthrough
CT: control target
= control target key end

     0   :  { %10 = vsyncpa [#allocation3], 0  ;;  %s334_s18 = smov [#allocation2]   ;;  %s388_s0 = inlined_call_operand.vmem [shape: f32[8,4], index: 0, kind: input, shape index: {}]   ;;  %s389_s1 = inlined_call_operand.vmem [shape: f32[4,256], index: 1, kind: input, shape index: {}]   ;;  %s390_s2 = inlined_call_operand.vmem [shape: f32[1,256], index: 2, kind: input, shape index: {}]   ;;  %s391_s3 = inlined_call_operand.hbm [shape: f32[256,128], index: 3, kind: input, shape index: {}]   ;;  %s392_s4 = inlined_call_operand.vmem [shape: f32[1,128], index: 4, kind: input, shape index: {}]   ;;  %s393_s5 = inlined_call_operand.vmem [shape: f32[8,128], index: 5, kind: output, shape index: {}]  }
   0x1   :  { %s22_s19 = sshll.u32 %s334_s18, 4  ;;  %s23_s19 = int_to_ptr.vmem [resolvable:$true] %s22_s19 }
   0x2   :  { %s320_s20 = scalar_lea.vmem %s23_s19, 4096  ;;  %p325_p1 = scmp.lt.s32.totalorder %s23_s19, %s23_s19 }
   0x3   :  { %p321_p0 = scmp.ne.s32.totalorder %s23_s19, %s320_s20  ;;  %p326_p2 = scmp.lt.s32.totalorder %s320_s20, %s320_s20 }
   0x5   :  { %p327_p3 = por %p326_p2, %p325_p1 }
   0x7   :  { %p328_p4 = pnand %p327_p3, %p321_p0 }
   0x9   :  { %331 = shalt.err (!%p328_p4)
}
   0xa   :  { %s335_s21 = smov 128   ;;  %s336_s22 = smov 8  }
   0xb   :  { %28 = dma.hbm_to_vmem [thread:$0]  %s391_s3, 4096, %s23_s19, [#allocation3], %s335_s21, %s335_s21, %s336_s22  }
   0xc   :  { %332 = dma.done.wait [#allocation3], 4096  }
   0xd   :  { %333 = vsyncadd [#allocation3], 4294963200  ;;  %v337_v0 = vmov 0.0   ;;  %v35_v1 = vld [vmem:[%s389_s1] sm:$0xff]  ;;  %vm54_vm0 = vcmask 1043456   ;;  %v163_v2 = vld [vmem:[#allocation2 + $0xf8] sm:$0xff]  ;;  %v38_v36 = vlaneseq }
   0xe   :  { %123 = vmatprep.mubr.f32.mxu0 %v337_v0  ;;  %v49_v3 = vcombine.high %v35_v1, %v35_v1  ;;  %268 = vmatprep.subr.mxu1 %v163_v2  ;;  %v147_v4 = vld [vmem:[#allocation2 + $0x78] sm:$0xff]  ;;  %v162_v5 = vld [vmem:[#allocation2 + $0xf0] sm:$0xff]  ;;  %v34_v7 = vld [vmem:[%s388_s0] sm:$0xff]  ;;  %vm50_vm1 = vcmask 31744  }
   0xf   :  { %v146_v6 = vld [vmem:[#allocation2 + $0x70] sm:$0xff]  ;;  %269 = vmatpush3.msra.mxu1 %v147_v4  ;;  %v161_v8 = vld [vmem:[#allocation2 + $0xe8] sm:$0xff]  ;;  %v160_v10 = vld [vmem:[#allocation2 + $0xe0] sm:$0xff]  ;;  %v39_v37 = vshrl.u32 %v38_v36, 7  ;;  %v242_v50 = vand.u32 127, %v38_v36 }
  0x10   :  { %264 = vmatprep.subr.msk.mxu0 %vm54_vm0, %v49_v3  ;;  %270 = vmatprep.subr.mxu1 %v162_v5  ;;  %v145_v9 = vld [vmem:[#allocation2 + $0x68] sm:$0xff]  ;;  %v144_v11 = vld [vmem:[#allocation2 + $0x60] sm:$0xff]  ;;  %v159_v12 = vld [vmem:[#allocation2 + $0xd8] sm:$0xff] }
  0x11   :  { %265 = vmatpush1.msk.msra.mxu0 %vm54_vm0, %v35_v1  ;;  %271 = vmatpush3.msra.mxu1 %v146_v6  ;;  %v143_v13 = vld [vmem:[#allocation2 + $0x58] sm:$0xff]  ;;  %v158_v14 = vld [vmem:[#allocation2 + $0xd0] sm:$0xff]  ;;  %v157_v16 = vld [vmem:[#allocation2 + $0xc8] sm:$0xff]  ;;  %v40_v38 = vsub.s32 0, %v39_v37  ;;  %v44_v40 = vsub.s32 1, %v39_v37  ;;  %vm243_vm2 = vcmp.lt.s32.totalorder %v242_v50, 5 }
  0x12   :  { %266 = vmatmul.mubr.msk.f32.vlgmr.msra.gmra.mxu0 %vm50_vm1, %v34_v7  ;;  %272 = vmatprep.subr.mxu1 %v161_v8  ;;  %v142_v15 = vld [vmem:[#allocation2 + $0x50] sm:$0xff]  ;;  %v141_v17 = vld [vmem:[#allocation2 + $0x48] sm:$0xff]  ;;  %v156_v18 = vld [vmem:[#allocation2 + $0xc0] sm:$0xff] }
  0x13   :  { %273 = vmatpush3.msra.mxu1 %v145_v9  ;;  %v140_v19 = vld [vmem:[#allocation2 + $0x40] sm:$0xff]  ;;  %v155_v20 = vld [vmem:[#allocation2 + $0xb8] sm:$0xff]  ;;  %v154_v22 = vld [vmem:[#allocation2 + $0xb0] sm:$0xff] }
  0x14   :  { %274 = vmatprep.subr.mxu1 %v160_v10  ;;  %v139_v21 = vld [vmem:[#allocation2 + $0x38] sm:$0xff]  ;;  %v138_v23 = vld [vmem:[#allocation2 + $0x30] sm:$0xff]  ;;  %v153_v24 = vld [vmem:[#allocation2 + $0xa8] sm:$0xff] }
  0x15   :  { %275 = vmatpush3.msra.mxu1 %v144_v11  ;;  %v137_v25 = vld [vmem:[#allocation2 + $0x28] sm:$0xff]  ;;  %v152_v26 = vld [vmem:[#allocation2 + $0xa0] sm:$0xff]  ;;  %v151_v28 = vld [vmem:[#allocation2 + $0x98] sm:$0xff] }
  0x16   :  { %276 = vmatprep.subr.mxu1 %v159_v12  ;;  %v136_v27 = vld [vmem:[#allocation2 + $0x20] sm:$0xff]  ;;  %v135_v29 = vld [vmem:[#allocation2 + $0x18] sm:$0xff]  ;;  %v150_v30 = vld [vmem:[#allocation2 + $0x90] sm:$0xff] }
  0x17   :  { %277 = vmatpush3.msra.mxu1 %v143_v13  ;;  %v134_v31 = vld [vmem:[#allocation2 + $0x10] sm:$0xff]  ;;  %v149_v32 = vld [vmem:[#allocation2 + $0x88] sm:$0xff]  ;;  %v148_v34 = vld [vmem:[#allocation2 + $0x80] sm:$0xff] }
  0x18   :  { %278 = vmatprep.subr.mxu1 %v158_v14  ;;  %v133_v33 = vld [vmem:[#allocation2 + $0x8] sm:$0xff]  ;;  %v132_v35 = vld [vmem:[#allocation2] sm:$0xff] }
  0x19   :  { %279 = vmatpush3.msra.mxu1 %v142_v15  ;;  %v36_v39 = vld [vmem:[%s390_s2] sm:$0x3] }
  0x1a   :  { %280 = vmatprep.subr.mxu1 %v157_v16  ;;  %v41_v41 = vrot.slane %v36_v39, %v40_v38  ;;  %v45_v42 = vrot.slane %v36_v39, %v44_v40  ;;  %v267_v52 = vld [vmem:[%s392_s4] ss:$0 sm:$0xff] }
  0x1b   :  { %281 = vmatpush3.msra.mxu1 %v141_v17 }
  0x1c   :  { %282 = vmatprep.subr.mxu1 %v156_v18 }
  0x1d   :  { %283 = vmatpush3.msra.mxu1 %v140_v19 }
  0x1e   :  { %284 = vmatprep.subr.mxu1 %v155_v20 }
  0x1f   :  { %285 = vmatpush3.msra.mxu1 %v139_v21 }
  0x20   :  { %286 = vmatprep.subr.mxu1 %v154_v22 }
  0x21   :  { %287 = vmatpush3.msra.mxu1 %v138_v23 }
  0x22   :  { %288 = vmatprep.subr.mxu1 %v153_v24 }
  0x23   :  { %289 = vmatpush3.msra.mxu1 %v137_v25 }
  0x24   :  { %290 = vmatprep.subr.mxu1 %v152_v26 }
  0x25   :  { %291 = vmatpush3.msra.mxu1 %v136_v27 }
  0x26   :  { %292 = vmatprep.subr.mxu1 %v151_v28 }
  0x27   :  { %293 = vmatpush3.msra.mxu1 %v135_v29 }
  0x28   :  { %294 = vmatprep.subr.mxu1 %v150_v30 }
  0x29   :  { %295 = vmatpush3.msra.mxu1 %v134_v31 }
  0x2a   :  { %296 = vmatprep.subr.mxu1 %v149_v32 }
  0x2b   :  { %297 = vmatpush3.msra.mxu1 %v133_v33 }
  0x2c   :  { %298 = vmatprep.subr.mxu1 %v148_v34 }
  0x2d   :  { %299 = vmatpush3.msra.mxu1 %v132_v35 }
  0xd2   :  { %v125_v43 = vpop.f32.mrf.mxu0 }
  0xd3   :  { %v126_v44 = vadd.f32 %v125_v43, %v41_v41 }
  0xd4   :  { %v127_v45 = vpop.f32.mrf.mxu0 }
  0xd5   :  { %v128_v46 = vadd.f32 %v127_v45, %v45_v42  ;;  %v130_v48 = vmax.f32 %v126_v44, 0.0 }
  0xd7   :  { %v131_v47 = vmax.f32 %v128_v46, 0.0 }
  0xd9   :  { %235 = vmatprep.mubr.f32.mxu1 %v131_v47 }
  0xda   :  { %236 = vmatmul.mubr.f32.vlgmr.msra.gmra.mxu1 %v130_v48 }
 0x19a   :  { %v300_v49 = vpop.f32.mrf.mxu1 }
 0x19c   :  { %v301_v51 = vpop.f32.mrf.mxu1 }
 0x19d   :  { %v302_v53 = vadd.f32 %v301_v51, %v300_v49 }
 0x19f   :  { %v238_v54 = vadd.f32 %v302_v53, %v267_v52 }
 0x1a1   :  { %v244_v55 = vsel %vm243_vm2, %v238_v54, -inf }
 0x1a2   :  { %245 = vmax.xlane.f32.xlu0 %v244_v55 }
 0x22b   :  { %v246_v56 = vpop.xlane.xlu0 %245 }
 0x22c   :  { %v247_v57 = vsub.f32 %v244_v55, %v246_v56 }
 0x22e   :  { %v248_v58 = vmul.f32 1.442695, %v247_v57 }
 0x230   :  { %308 = vpow2.f32 %v248_v58 }
 0x23d   :  { %v309_v59 = vpop.eup %308 }
 0x23e   :  { %250 = vadd.xlane.f32.xlu0 %v309_v59 }
 0x2c7   :  { %v251_v60 = vpop.xlane.xlu0 %250 }
 0x2c8   :  { %310 = vrcp.f32 %v251_v60 }
 0x2d5   :  { %v311_v61 = vpop.eup %310 }
 0x2d6   :  { %v253_v62 = vmul.f32 %v311_v61, %v251_v60 }
 0x2d8   :  { %v254_v63 = vsub.f32 2.0, %v253_v62 }
 0x2da   :  { %v255_v0 = vmul.f32 %v311_v61, %v254_v63 }
 0x2dc   :  { %v256_v1 = vmul.f32 %v309_v59, %v255_v0 }
 0x2de   :  { %v257_v2 = vsel %vm243_vm2, %v256_v1, %v238_v54 }
 0x2df   :  { %258 = vst [vmem:[%s393_s5] sm:$0xff] %v257_v2 }
 0x2e0   :  { %263 = vsyncpa [#allocation3], 1 }

</bundles_post_ra>
